<compile_context>
chip_gen: v7x
topology: tpu7x:2x2x1
jax: 0.10.0
libtpu: 0.0.40
codegen_flags: <defaults>
</compile_context>

<pallas_src>
import jax
import jax.numpy as jnp
from jax.experimental import pallas as pl
from jax.experimental.pallas import tpu as pltpu


# Max rows of x per grid step: 8 MiB f32 tile, 16 MiB double-buffered.
_TB_MAX = 8192


def _pick_batch_tile(B):
    """Batch tile: big fixed tile for large B, else ~B/2 so the grid has at
    least 2 steps (keeps both v7x TensorCores busy).  Always a multiple of 8
    (sublane) so the block shape is legal."""
    if B >= 2 * _TB_MAX:
        return _TB_MAX
    tb = ((pl.cdiv(B, 2) + 7) // 8) * 8
    return max(8, min(tb, _TB_MAX))


def _linear_kernel(x_ref, w_ref, b_ref, o_ref):
    # y = x @ W_t + b : W_t is already (K, N) = (256, 2), so the MXU contracts
    # natively with no RHS relayout.  f32 accumulation, bias add, one store.
    acc = jnp.dot(x_ref[...], w_ref[...], preferred_element_type=jnp.float32)
    o_ref[...] = (acc + b_ref[...]).astype(o_ref.dtype)


def domain_classifier_forward(x, weight, bias):
    """Pallas equivalent of nn.Linear(256, 2): y = x @ weight.T + bias.

    x:      [B, 256] float32
    weight: [2, 256] float32 (PyTorch layout)
    bias:   [2]      float32
    returns [B, 2]   float32
    """
    B, D = x.shape
    out_features = weight.shape[0]

    # One-time 2 KiB layout fixes in the wrapper (free), so the kernel sees
    # an MXU-native (K, N) weight and a broadcastable (1, N) bias.
    w_t = weight.T.reshape(D, out_features)
    b2 = bias.reshape(1, out_features)

    tb = _pick_batch_tile(B)
    grid = (pl.cdiv(B, tb),)  # ragged last block is masked by Pallas

    return pl.pallas_call(
        _linear_kernel,
        out_shape=jax.ShapeDtypeStruct((B, out_features), x.dtype),
        grid=grid,
        in_specs=[
            pl.BlockSpec((tb, D), lambda i: (i, 0)),                # x tile (streamed)
            pl.BlockSpec((D, out_features), lambda i: (0, 0)),      # weight (resident)
            pl.BlockSpec((1, out_features), lambda i: (0, 0)),      # bias (resident)
        ],
        out_specs=pl.BlockSpec((tb, out_features), lambda i: (i, 0)),
        compiler_params=pltpu.CompilerParams(
            dimension_semantics=("parallel",),
            # Explicit budget: 16 MiB x (double-buffered) + 8 MiB lane-padded
            # out buffers + weight/bias ~= 24.3 MiB; 40 MiB leaves headroom and
            # is within physical VMEM on v5e/v6e (128 MiB) and v7x (64 MiB/TC).
            vmem_limit_bytes=40 * 1024 * 1024,
        ),
    )(x, w_t, b2)


if __name__ == "__main__":
    key = jax.random.PRNGKey(0)
    k_x, k_w, k_b, k_x2, k_x3 = jax.random.split(key, 5)

    D, OUT = 256, 2

    # Deterministic synthetic parameters (PyTorch-style uniform(-1/sqrt(D), 1/sqrt(D)))
    bound = 1.0 / (D ** 0.5)
    weight = jax.random.uniform(k_w, (OUT, D), jnp.float32, -bound, bound)
    bias = jax.random.uniform(k_b, (OUT,), jnp.float32, -bound, bound)

    # Small-batch check (module-scale input, single grid step).
    B_small = 8
    x_small = jax.random.normal(k_x, (B_small, D), jnp.float32)
    y_small = jax.block_until_ready(domain_classifier_forward(x_small, weight, bias))
    y_small_ref = x_small @ weight.T + bias
    assert y_small.shape == (B_small, OUT)
    assert jnp.allclose(y_small, y_small_ref, atol=1e-5, rtol=1e-5)

    # Tiny batch not a multiple of 8 (ragged last block, no padding path).
    B_odd = 13
    x_odd = jax.random.normal(k_x3, (B_odd, D), jnp.float32)
    y_odd = jax.block_until_ready(domain_classifier_forward(x_odd, weight, bias))
    y_odd_ref = x_odd @ weight.T + bias
    assert y_odd.shape == (B_odd, OUT)
    assert jnp.allclose(y_odd, y_odd_ref, atol=1e-5, rtol=1e-5)

    # Larger, non-tile-multiple batch (multi-step grid + masked ragged block).
    B_big = 4100
    x_big = jax.random.normal(k_x2, (B_big, D), jnp.float32)
    y_big = jax.block_until_ready(domain_classifier_forward(x_big, weight, bias))
    y_big_ref = x_big @ weight.T + bias
    assert y_big.shape == (B_big, OUT)
    assert jnp.allclose(y_big, y_big_ref, atol=1e-5, rtol=1e-5)

    print("KERNEL_OK")
</pallas_src>

<mosaic_0001>
module attributes {stable_mosaic.version = 11 : i64} {
  func.func @_linear_kernel(%arg0: i32, %arg1: memref<8x256xf32, #tpu.memory_space<vmem>>, %arg2: memref<256x2xf32, #tpu.memory_space<vmem>>, %arg3: memref<1x2xf32, #tpu.memory_space<vmem>>, %arg4: memref<8x2xf32, #tpu.memory_space<vmem>>) attributes {dimension_semantics = [#tpu.dimension_semantics<parallel>], iteration_bounds = array<i64: 1>, scalar_prefetch = 0 : i64, scratch_operands = 0 : i64, tpu.core_type = #tpu.core_type<tc>, window_params = [{transform_indices = @transform_0, window_bounds = array<i64: 8, 256>}, {pipeline_mode = #tpu.pipeline_mode<synchronous>, transform_indices = @transform_1, window_bounds = array<i64: 256, 2>}, {pipeline_mode = #tpu.pipeline_mode<synchronous>, transform_indices = @transform_2, window_bounds = array<i64: 1, 2>}, {transform_indices = @transform_3, window_bounds = array<i64: 8, 2>}]} {
    %c0 = arith.constant 0 : index
    %c0_0 = arith.constant 0 : index
    %0 = vector.load %arg1[%c0, %c0_0] : memref<8x256xf32, #tpu.memory_space<vmem>>, vector<8x256xf32>
    %c0_1 = arith.constant 0 : index
    %c0_2 = arith.constant 0 : index
    %1 = vector.load %arg2[%c0_1, %c0_2] : memref<256x2xf32, #tpu.memory_space<vmem>>, vector<256x2xf32>
    %cst = arith.constant dense<0.000000e+00> : vector<8x2xf32>
    %2 = tpu.matmul %0, %1, %cst {dimension_numbers = #tpu.dot_dimension_numbers<[1], [0], [0], [1], [0, 0, 1, 1], [], []>} : vector<8x256xf32>, vector<256x2xf32>, vector<8x2xf32> -> vector<8x2xf32>
    %c0_3 = arith.constant 0 : index
    %c0_4 = arith.constant 0 : index
    %3 = vector.load %arg3[%c0_3, %c0_4] : memref<1x2xf32, #tpu.memory_space<vmem>>, vector<1x2xf32>
    %4 = vector.broadcast %3 : vector<1x2xf32> to vector<8x2xf32>
    %5 = arith.addf %2, %4 : vector<8x2xf32>
    %c0_5 = arith.constant 0 : index
    %c0_6 = arith.constant 0 : index
    %6 = vector.load %arg4[%c0_5, %c0_6] : memref<8x2xf32, #tpu.memory_space<vmem>>, vector<8x2xf32>
    tpu.vector_store %arg4[%c0_5, %c0_6], %5 {strides = array<i32>} : memref<8x2xf32, #tpu.memory_space<vmem>>, vector<8x2xf32>,
    return
  }
  func.func @transform_0(%arg0: i32) -> (i32, i32) {
    %c0_i32 = arith.constant 0 : i32
    %c0_i32_0 = arith.constant 0 : i32
    return %arg0, %c0_i32 : i32, i32
  }
  func.func @transform_1(%arg0: i32) -> (i32, i32) {
    %c0_i32 = arith.constant 0 : i32
    %c0_i32_0 = arith.constant 0 : i32
    %c0_i32_1 = arith.constant 0 : i32
    return %c0_i32, %c0_i32_0 : i32, i32
  }
  func.func @transform_2(%arg0: i32) -> (i32, i32) {
    %c0_i32 = arith.constant 0 : i32
    %c0_i32_0 = arith.constant 0 : i32
    %c0_i32_1 = arith.constant 0 : i32
    return %c0_i32, %c0_i32_0 : i32, i32
  }
  func.func @transform_3(%arg0: i32) -> (i32, i32) {
    %c0_i32 = arith.constant 0 : i32
    %c0_i32_0 = arith.constant 0 : i32
    return %arg0, %c0_i32 : i32, i32
  }
}

</mosaic_0001>

<bundles_post_ra>
// kernel: tpu_custom_call.1
= control target key start
LH: loop header
LB: loop body
LE: loop exit
PB: predicated region body
PF: predicated region fallthrough
CT: control target
= control target key end

     0   :  { %vm125_vm0 = vcmask 15360   ;;  %s327_s1 = inlined_call_operand.vmem [shape: f32[256,2], index: 1, kind: input, shape index: {}]   ;;  %s328_s0 = inlined_call_operand.vmem [shape: f32[8,256], index: 0, kind: input, shape index: {}]   ;;  %s329_s2 = inlined_call_operand.vmem [shape: f32[1,2], index: 2, kind: input, shape index: {}]   ;;  %s330_s3 = inlined_call_operand.vmem [shape: f32[8,2], index: 3, kind: output, shape index: {}]  }
   0x1   :  { %v32_v0 = vld [vmem:[%s327_s1 + $0x80] sm:$0xff]  ;;  %v33_v1 = vld [vmem:[%s327_s1 + $0x88] sm:$0xff]  ;;  %v34_v5 = vld [vmem:[%s327_s1 + $0x90] sm:$0xff] }
   0x2   :  { %v16_v2 = vld [vmem:[%s327_s1] sm:$0xff]  ;;  %v167_v3 = vpack.c.bf16 %v33_v1, %v32_v0  ;;  %v17_v4 = vld [vmem:[%s327_s1 + $0x8] sm:$0xff]  ;;  %v35_v6 = vld [vmem:[%s327_s1 + $0x98] sm:$0xff] }
   0x3   :  { %v169_v7 = vpack.c.bf16 %v17_v4, %v16_v2  ;;  %v171_v8 = vpack.c.bf16 %v35_v6, %v34_v5  ;;  %v18_v9 = vld [vmem:[%s327_s1 + $0x10] sm:$0xff]  ;;  %v19_v10 = vld [vmem:[%s327_s1 + $0x18] sm:$0xff]  ;;  %v36_v11 = vld [vmem:[%s327_s1 + $0xa0] sm:$0xff] }
   0x4   :  { %168 = vmatprep.subr.bf16.mxu0 %v167_v3  ;;  %v37_v12 = vld [vmem:[%s327_s1 + $0xa8] sm:$0xff]  ;;  %v173_v13 = vpack.c.bf16 %v19_v10, %v18_v9  ;;  %v20_v15 = vld [vmem:[%s327_s1 + $0x20] sm:$0xff]  ;;  %v38_v17 = vld [vmem:[%s327_s1 + $0xb0] sm:$0xff] }
   0x5   :  { %170 = vmatpush3.bf16.msra.mxu0 %v169_v7  ;;  %v175_v14 = vpack.c.bf16 %v37_v12, %v36_v11  ;;  %v21_v16 = vld [vmem:[%s327_s1 + $0x28] sm:$0xff]  ;;  %v39_v18 = vld [vmem:[%s327_s1 + $0xb8] sm:$0xff]  ;;  %v22_v21 = vld [vmem:[%s327_s1 + $0x30] sm:$0xff] }
   0x6   :  { %172 = vmatprep.subr.bf16.mxu0 %v171_v8  ;;  %v177_v19 = vpack.c.bf16 %v21_v16, %v20_v15  ;;  %v179_v20 = vpack.c.bf16 %v39_v18, %v38_v17  ;;  %v23_v22 = vld [vmem:[%s327_s1 + $0x38] sm:$0xff]  ;;  %v40_v23 = vld [vmem:[%s327_s1 + $0xc0] sm:$0xff]  ;;  %v41_v24 = vld [vmem:[%s327_s1 + $0xc8] sm:$0xff] }
   0x7   :  { %v15_v25 = vld [vmem:[%s328_s0 + $0x8] sm:$0xff]  ;;  %v181_v26 = vpack.c.bf16 %v23_v22, %v22_v21  ;;  %v183_v27 = vpack.c.bf16 %v41_v24, %v40_v23  ;;  %v24_v28 = vld [vmem:[%s327_s1 + $0x40] sm:$0xff]  ;;  %v42_v30 = vld [vmem:[%s327_s1 + $0xd0] sm:$0xff] }
   0x8   :  { %119 = vmatprep.mubr.f32.mxu0 %v15_v25  ;;  %v25_v29 = vld [vmem:[%s327_s1 + $0x48] sm:$0xff]  ;;  %v43_v31 = vld [vmem:[%s327_s1 + $0xd8] sm:$0xff]  ;;  %v26_v34 = vld [vmem:[%s327_s1 + $0x50] sm:$0xff] }
   0x9   :  { %174 = vmatpush3.bf16.msra.mxu0 %v173_v13  ;;  %v185_v32 = vpack.c.bf16 %v25_v29, %v24_v28  ;;  %v187_v33 = vpack.c.bf16 %v43_v31, %v42_v30  ;;  %v27_v35 = vld [vmem:[%s327_s1 + $0x58] sm:$0xff]  ;;  %v44_v36 = vld [vmem:[%s327_s1 + $0xe0] sm:$0xff]  ;;  %v45_v37 = vld [vmem:[%s327_s1 + $0xe8] sm:$0xff] }
   0xa   :  { %176 = vmatprep.subr.bf16.mxu0 %v175_v14  ;;  %v189_v38 = vpack.c.bf16 %v27_v35, %v26_v34  ;;  %v191_v39 = vpack.c.bf16 %v45_v37, %v44_v36  ;;  %v28_v40 = vld [vmem:[%s327_s1 + $0x60] sm:$0xff]  ;;  %v29_v41 = vld [vmem:[%s327_s1 + $0x68] sm:$0xff]  ;;  %v46_v42 = vld [vmem:[%s327_s1 + $0xf0] sm:$0xff] }
   0xb   :  { %v47_v43 = vld [vmem:[%s327_s1 + $0xf8] sm:$0xff]  ;;  %v193_v44 = vpack.c.bf16 %v29_v41, %v28_v40  ;;  %v30_v46 = vld [vmem:[%s327_s1 + $0x70] sm:$0xff]  ;;  %v14_v49 = vld [vmem:[%s328_s0] sm:$0xff] }
   0xc   :  { %v195_v45 = vpack.c.bf16 %v47_v43, %v46_v42  ;;  %v31_v47 = vld [vmem:[%s327_s1 + $0x78] sm:$0xff]  ;;  %v131_v51 = vld [vmem:[%s329_s2] ss:$0 sm:$0xff] }
   0xd   :  { %178 = vmatpush3.bf16.msra.mxu0 %v177_v19  ;;  %v197_v48 = vpack.c.bf16 %v31_v47, %v30_v46 }
   0xe   :  { %180 = vmatprep.subr.bf16.mxu0 %v179_v20 }
  0x11   :  { %182 = vmatpush3.bf16.msra.mxu0 %v181_v26 }
  0x12   :  { %184 = vmatprep.subr.bf16.mxu0 %v183_v27 }
  0x15   :  { %186 = vmatpush3.bf16.msra.mxu0 %v185_v32 }
  0x16   :  { %188 = vmatprep.subr.bf16.mxu0 %v187_v33 }
  0x19   :  { %190 = vmatpush3.bf16.msra.mxu0 %v189_v38 }
  0x1a   :  { %192 = vmatprep.subr.bf16.mxu0 %v191_v39 }
  0x1d   :  { %194 = vmatpush3.bf16.msra.mxu0 %v193_v44 }
  0x1e   :  { %196 = vmatprep.subr.bf16.mxu0 %v195_v45 }
  0x21   :  { %198 = vmatpush3.bf16.msra.mxu0 %v197_v48 }
  0x24   :  { %120 = vmatmul.mubr.f32.vlgmr.msra.gmra.mrb[0].mxu0 %v14_v49 }
  0xf7   :  { %v164_v50 = vpop.f32.mrb[0].mxu0 }
  0xf8   :  { %v165_v52 = vpop.f32.mrb[1].mxu0 }
  0xf9   :  { %v166_v53 = vadd.f32 %v165_v52, %v164_v50 }
  0xfb   :  { %v122_v54 = vadd.f32 %v166_v53, %v131_v51 }
  0xfd   :  { %126 = vst.msk [vmem:[%s330_s3] sm:$0xff] %vm125_vm0, %v122_v54 }

</bundles_post_ra>
